<compile_context>
chip_gen: v6e
topology: v6e:2x2x1
jax: 0.10.0
libtpu: 0.0.40
codegen_flags: <defaults>
</compile_context>

<pallas_src>
import jax
import jax.numpy as jnp
from jax.experimental import pallas as pl
from jax.experimental.pallas import tpu as pltpu


def _round_up(v, m):
    return ((v + m - 1) // m) * m


def _pad2(a, rows, cols):
    return jnp.pad(a, ((0, rows - a.shape[0]), (0, cols - a.shape[1])))


def _cfc_kernel(x_ref, h_ref, t_ref, w1x_ref, w1h_ref, b1_ref,
                wf_ref, bf_ref, tau_ref, a_ref, out_ref):
    # Backbone: Linear(in+hidden -> backbone) + ReLU, with the concat folded
    # into two matmuls (x-half and h-half of W1).  f32 accumulation on MXU.
    z = jnp.dot(x_ref[...], w1x_ref[...], preferred_element_type=jnp.float32)
    z = z + jnp.dot(h_ref[...], w1h_ref[...], preferred_element_type=jnp.float32)
    z = jnp.maximum(z + b1_ref[...], 0.0)

    # f = Linear(backbone -> hidden)
    f = jnp.dot(z.astype(wf_ref.dtype), wf_ref[...],
                preferred_element_type=jnp.float32) + bf_ref[...]

    # CfC gating (f32 on VPU/EUP): h_new = -A * exp(-t * (|tau| + |f|)) * f + A
    t = t_ref[...]                                  # (TB, 1) broadcasts over hidden
    a = a_ref[...]                                  # (1, HP)
    tau_abs = jnp.abs(tau_ref[...])                 # (1, HP)
    gate = jnp.exp(-t * (tau_abs + jnp.abs(f)))     # exp -> EUP slot (free-ish)
    out_ref[...] = (-a * gate * f + a).astype(out_ref.dtype)


def cfc_forward(x, h, t, params, *, matmul_dtype=jnp.bfloat16, batch_tile=256):
    """Pallas implementation of CfCCell.forward.

    x: (B, in_features), h: (B, hidden), t: (B,) or (B, 1)
    params: W1 (bb, in+hid), b1 (bb,), Wf (hid, bb), bf (hid,),
            tau (1, hid), A (1, hid)   -- PyTorch nn.Linear convention.
    """
    B, IN = x.shape
    HID = h.shape[1]
    BB = params["W1"].shape[0]

    # Lane-dense padded sizes (128-wide MXU columns / unmasked stores).
    BBP = _round_up(BB, 128)
    HP = _round_up(HID, 128)
    # Batch tile: multiple of 8 sublanes, capped at `batch_tile` rows.
    TB = batch_tile if B >= batch_tile else _round_up(B, 8)
    BP = _round_up(B, TB)
    grid = (pl.cdiv(BP, TB),)

    f32 = jnp.float32

    # Activations: pad batch only; feature dims stay un-padded (block = full dim).
    xp = _pad2(x.astype(f32), BP, IN).astype(matmul_dtype)          # (BP, IN)
    hp = _pad2(h.astype(f32), BP, HID).astype(matmul_dtype)         # (BP, HID)
    tp = _pad2(jnp.reshape(t, (B, 1)).astype(f32), BP, 1)           # (BP, 1)

    # Weights: split W1 into x-half / h-half, transpose, pad backbone/hidden
    # dims with zeros (padded columns are inert: zero weights, bias, A).
    W1 = params["W1"].astype(f32)                                   # (BB, IN+HID)
    w1x = _pad2(W1[:, :IN].T, IN, BBP).astype(matmul_dtype)         # (IN, BBP)
    w1h = _pad2(W1[:, IN:].T, HID, BBP).astype(matmul_dtype)        # (HID, BBP)
    b1 = _pad2(jnp.reshape(params["b1"].astype(f32), (1, -1)), 1, BBP)
    wf = _pad2(params["Wf"].astype(f32).T, BBP, HP).astype(matmul_dtype)  # (BBP, HP)
    bf = _pad2(jnp.reshape(params["bf"].astype(f32), (1, -1)), 1, HP)
    tau = _pad2(params["tau"].astype(f32), 1, HP)
    A = _pad2(params["A"].astype(f32), 1, HP)

    batch_spec = lambda shape: pl.BlockSpec(shape, lambda i: (i, 0))
    const_spec = lambda shape: pl.BlockSpec(shape, lambda i: (0, 0))

    args = (xp, hp, tp, w1x, w1h, b1, wf, bf, tau, A)
    bytes_accessed = int(sum(a.size * a.dtype.itemsize for a in args)
                         + BP * HP * 4)
    cost = pl.CostEstimate(
        flops=2 * BP * (IN + HID) * BBP + 2 * BP * BBP * HP,
        transcendentals=BP * HP,
        bytes_accessed=bytes_accessed,
    )

    out = pl.pallas_call(
        _cfc_kernel,
        out_shape=jax.ShapeDtypeStruct((BP, HP), jnp.float32),
        grid=grid,
        in_specs=[
            batch_spec((TB, IN)),     # x
            batch_spec((TB, HID)),    # h
            batch_spec((TB, 1)),      # t
            const_spec((IN, BBP)),    # W1 x-half (transposed)
            const_spec((HID, BBP)),   # W1 h-half (transposed)
            const_spec((1, BBP)),     # b1
            const_spec((BBP, HP)),    # Wf (transposed)
            const_spec((1, HP)),      # bf
            const_spec((1, HP)),      # tau
            const_spec((1, HP)),      # A
        ],
        out_specs=batch_spec((TB, HP)),
        compiler_params=pltpu.CompilerParams(
            # "parallel": batch tiles are independent -> shards across v7x's
            # 2 TensorCores; harmless on v5e/v6e.
            dimension_semantics=("parallel",)),
        cost_estimate=cost,
    )(*args)

    return out[:B, :HID]


def make_params(key, in_features, hidden_features, backbone_features):
    """Deterministic parameter init (xavier-uniform-like for 2-D params)."""
    k1, k2, k3, k4, k5, k6 = jax.random.split(key, 6)

    def xavier(k, shape):
        fan_in, fan_out = shape[1], shape[0]
        limit = jnp.sqrt(6.0 / (fan_in + fan_out))
        return jax.random.uniform(k, shape, jnp.float32, -limit, limit)

    cat = in_features + hidden_features
    return {
        "W1": xavier(k1, (backbone_features, cat)),
        "b1": jax.random.normal(k2, (backbone_features,), jnp.float32) * 0.01,
        "Wf": xavier(k3, (hidden_features, backbone_features)),
        "bf": jax.random.normal(k4, (hidden_features,), jnp.float32) * 0.01,
        # tau / A are (1, hidden) 2-D params -> xavier-inited in PyTorch too
        "tau": xavier(k5, (1, hidden_features)),
        "A": xavier(k6, (1, hidden_features)),
    }


def cfc_reference(x, h, t, params):
    """Pure-JAX reference of the PyTorch forward, for verification."""
    B = x.shape[0]
    t2 = jnp.reshape(t, (B, 1))
    xh = jnp.concatenate([x, h], axis=1)
    z = jnp.maximum(xh @ params["W1"].T + params["b1"], 0.0)
    f = z @ params["Wf"].T + params["bf"]
    A, tau = params["A"], params["tau"]
    return -A * jnp.exp(-t2 * (jnp.abs(tau) + jnp.abs(f))) * f + A


if __name__ == "__main__":
    # Small shapes consistent with the module's forward.
    B, IN, HID, BB = 8, 16, 32, 8

    key = jax.random.PRNGKey(0)
    kx, kh, kt, kp = jax.random.split(key, 4)
    x = jax.random.normal(kx, (B, IN), jnp.float32)
    h = jax.random.normal(kh, (B, HID), jnp.float32)
    t = jax.random.uniform(kt, (B,), jnp.float32)

    params = make_params(kp, IN, HID, BB)
    ref = cfc_reference(x, h, t, params)

    # f32 matmul path: bit-tight check against the reference.
    out_f32 = jax.block_until_ready(
        cfc_forward(x, h, t, params, matmul_dtype=jnp.float32))
    assert out_f32.shape == (B, HID)
    assert jnp.allclose(out_f32, ref, atol=1e-5, rtol=1e-5), "f32 mismatch"

    # Default fast path: bf16 MXU operands, f32 accumulation + f32 gating.
    out_bf16 = jax.block_until_ready(cfc_forward(x, h, t, params))
    assert out_bf16.shape == (B, HID)
    assert jnp.allclose(out_bf16, ref, atol=3e-2, rtol=3e-2), "bf16 mismatch"

    print("KERNEL_OK")
</pallas_src>

<mosaic_0001>
module attributes {stable_mosaic.version = 11 : i64} {
  func.func @_cfc_kernel(%arg0: i32, %arg1: memref<8x16xf32, #tpu.memory_space<vmem>>, %arg2: memref<8x32xf32, #tpu.memory_space<vmem>>, %arg3: memref<8x1xf32, #tpu.memory_space<vmem>>, %arg4: memref<16x128xf32, #tpu.memory_space<vmem>>, %arg5: memref<32x128xf32, #tpu.memory_space<vmem>>, %arg6: memref<1x128xf32, #tpu.memory_space<vmem>>, %arg7: memref<128x128xf32, #tpu.memory_space<vmem>>, %arg8: memref<1x128xf32, #tpu.memory_space<vmem>>, %arg9: memref<1x128xf32, #tpu.memory_space<vmem>>, %arg10: memref<1x128xf32, #tpu.memory_space<vmem>>, %arg11: memref<8x128xf32, #tpu.memory_space<vmem>>) attributes {dimension_semantics = [#tpu.dimension_semantics<parallel>], iteration_bounds = array<i64: 1>, scalar_prefetch = 0 : i64, scratch_operands = 0 : i64, tpu.core_type = #tpu.core_type<tc>, window_params = [{transform_indices = @transform_0, window_bounds = array<i64: 8, 16>}, {transform_indices = @transform_1, window_bounds = array<i64: 8, 32>}, {transform_indices = @transform_2, window_bounds = array<i64: 8, 1>}, {pipeline_mode = #tpu.pipeline_mode<synchronous>, transform_indices = @transform_3, window_bounds = array<i64: 16, 128>}, {pipeline_mode = #tpu.pipeline_mode<synchronous>, transform_indices = @transform_4, window_bounds = array<i64: 32, 128>}, {pipeline_mode = #tpu.pipeline_mode<synchronous>, transform_indices = @transform_5, window_bounds = array<i64: 1, 128>}, {pipeline_mode = #tpu.pipeline_mode<synchronous>, transform_indices = @transform_6, window_bounds = array<i64: 128, 128>}, {pipeline_mode = #tpu.pipeline_mode<synchronous>, transform_indices = @transform_7, window_bounds = array<i64: 1, 128>}, {pipeline_mode = #tpu.pipeline_mode<synchronous>, transform_indices = @transform_8, window_bounds = array<i64: 1, 128>}, {pipeline_mode = #tpu.pipeline_mode<synchronous>, transform_indices = @transform_9, window_bounds = array<i64: 1, 128>}, {transform_indices = @transform_10, window_bounds = array<i64: 8, 128>}]} {
    %c0 = arith.constant 0 : index
    %c0_0 = arith.constant 0 : index
    %0 = vector.load %arg1[%c0, %c0_0] : memref<8x16xf32, #tpu.memory_space<vmem>>, vector<8x16xf32>
    %c0_1 = arith.constant 0 : index
    %c0_2 = arith.constant 0 : index
    %1 = vector.load %arg4[%c0_1, %c0_2] : memref<16x128xf32, #tpu.memory_space<vmem>>, vector<16x128xf32>
    %cst = arith.constant dense<0.000000e+00> : vector<8x128xf32>
    %2 = tpu.matmul %0, %1, %cst {dimension_numbers = #tpu.dot_dimension_numbers<[1], [0], [0], [1], [0, 0, 1, 1], [], []>} : vector<8x16xf32>, vector<16x128xf32>, vector<8x128xf32> -> vector<8x128xf32>
    %c0_3 = arith.constant 0 : index
    %c0_4 = arith.constant 0 : index
    %3 = vector.load %arg2[%c0_3, %c0_4] : memref<8x32xf32, #tpu.memory_space<vmem>>, vector<8x32xf32>
    %c0_5 = arith.constant 0 : index
    %c0_6 = arith.constant 0 : index
    %4 = vector.load %arg5[%c0_5, %c0_6] : memref<32x128xf32, #tpu.memory_space<vmem>>, vector<32x128xf32>
    %cst_7 = arith.constant dense<0.000000e+00> : vector<8x128xf32>
    %5 = tpu.matmul %3, %4, %cst_7 {dimension_numbers = #tpu.dot_dimension_numbers<[1], [0], [0], [1], [0, 0, 1, 1], [], []>} : vector<8x32xf32>, vector<32x128xf32>, vector<8x128xf32> -> vector<8x128xf32>
    %6 = arith.addf %2, %5 : vector<8x128xf32>
    %c0_8 = arith.constant 0 : index
    %c0_9 = arith.constant 0 : index
    %7 = vector.load %arg6[%c0_8, %c0_9] : memref<1x128xf32, #tpu.memory_space<vmem>>, vector<1x128xf32>
    %8 = vector.broadcast %7 : vector<1x128xf32> to vector<8x128xf32>
    %9 = arith.addf %6, %8 : vector<8x128xf32>
    %cst_10 = arith.constant 0.000000e+00 : f32
    %10 = vector.broadcast %cst_10 : f32 to vector<8x128xf32>
    %11 = arith.maximumf %9, %10 : vector<8x128xf32>
    %c0_11 = arith.constant 0 : index
    %c0_12 = arith.constant 0 : index
    %12 = vector.load %arg7[%c0_11, %c0_12] : memref<128x128xf32, #tpu.memory_space<vmem>>, vector<128x128xf32>
    %cst_13 = arith.constant dense<0.000000e+00> : vector<8x128xf32>
    %13 = tpu.matmul %11, %12, %cst_13 {dimension_numbers = #tpu.dot_dimension_numbers<[1], [0], [0], [1], [0, 0, 1, 1], [], []>} : vector<8x128xf32>, vector<128x128xf32>, vector<8x128xf32> -> vector<8x128xf32>
    %c0_14 = arith.constant 0 : index
    %c0_15 = arith.constant 0 : index
    %14 = vector.load %arg8[%c0_14, %c0_15] : memref<1x128xf32, #tpu.memory_space<vmem>>, vector<1x128xf32>
    %15 = vector.broadcast %14 : vector<1x128xf32> to vector<8x128xf32>
    %16 = arith.addf %13, %15 : vector<8x128xf32>
    %c0_16 = arith.constant 0 : index
    %c0_17 = arith.constant 0 : index
    %17 = vector.load %arg3[%c0_16, %c0_17] : memref<8x1xf32, #tpu.memory_space<vmem>>, vector<8x1xf32>
    %c0_18 = arith.constant 0 : index
    %c0_19 = arith.constant 0 : index
    %18 = vector.load %arg10[%c0_18, %c0_19] : memref<1x128xf32, #tpu.memory_space<vmem>>, vector<1x128xf32>
    %c0_20 = arith.constant 0 : index
    %c0_21 = arith.constant 0 : index
    %19 = vector.load %arg9[%c0_20, %c0_21] : memref<1x128xf32, #tpu.memory_space<vmem>>, vector<1x128xf32>
    %20 = math.absf %19 : vector<1x128xf32>
    %cst_22 = arith.constant 0.000000e+00 : f32
    %21 = vector.broadcast %cst_22 : f32 to vector<8x1xf32>
    %22 = arith.subf %21, %17 : vector<8x1xf32>
    %23 = math.absf %16 : vector<8x128xf32>
    %24 = vector.broadcast %20 : vector<1x128xf32> to vector<8x128xf32>
    %25 = arith.addf %24, %23 : vector<8x128xf32>
    %26 = vector.broadcast %22 : vector<8x1xf32> to vector<8x128xf32>
    %27 = arith.mulf %26, %25 : vector<8x128xf32>
    %28 = math.exp %27 : vector<8x128xf32>
    %cst_23 = arith.constant 0.000000e+00 : f32
    %29 = vector.broadcast %cst_23 : f32 to vector<1x128xf32>
    %30 = arith.subf %29, %18 : vector<1x128xf32>
    %31 = vector.broadcast %30 : vector<1x128xf32> to vector<8x128xf32>
    %32 = arith.mulf %31, %28 : vector<8x128xf32>
    %33 = arith.mulf %32, %16 : vector<8x128xf32>
    %34 = vector.broadcast %18 : vector<1x128xf32> to vector<8x128xf32>
    %35 = arith.addf %33, %34 : vector<8x128xf32>
    %c0_24 = arith.constant 0 : index
    %c0_25 = arith.constant 0 : index
    %36 = vector.load %arg11[%c0_24, %c0_25] : memref<8x128xf32, #tpu.memory_space<vmem>>, vector<8x128xf32>
    tpu.vector_store %arg11[%c0_24, %c0_25], %35 {strides = array<i32>} : memref<8x128xf32, #tpu.memory_space<vmem>>, vector<8x128xf32>,
    return
  }
  func.func @transform_0(%arg0: i32) -> (i32, i32) {
    %c0_i32 = arith.constant 0 : i32
    %c0_i32_0 = arith.constant 0 : i32
    return %arg0, %c0_i32 : i32, i32
  }
  func.func @transform_1(%arg0: i32) -> (i32, i32) {
    %c0_i32 = arith.constant 0 : i32
    %c0_i32_0 = arith.constant 0 : i32
    return %arg0, %c0_i32 : i32, i32
  }
  func.func @transform_2(%arg0: i32) -> (i32, i32) {
    %c0_i32 = arith.constant 0 : i32
    %c0_i32_0 = arith.constant 0 : i32
    return %arg0, %c0_i32 : i32, i32
  }
  func.func @transform_3(%arg0: i32) -> (i32, i32) {
    %c0_i32 = arith.constant 0 : i32
    %c0_i32_0 = arith.constant 0 : i32
    %c0_i32_1 = arith.constant 0 : i32
    return %c0_i32, %c0_i32_0 : i32, i32
  }
  func.func @transform_4(%arg0: i32) -> (i32, i32) {
    %c0_i32 = arith.constant 0 : i32
    %c0_i32_0 = arith.constant 0 : i32
    %c0_i32_1 = arith.constant 0 : i32
    return %c0_i32, %c0_i32_0 : i32, i32
  }
  func.func @transform_5(%arg0: i32) -> (i32, i32) {
    %c0_i32 = arith.constant 0 : i32
    %c0_i32_0 = arith.constant 0 : i32
    %c0_i32_1 = arith.constant 0 : i32
    return %c0_i32, %c0_i32_0 : i32, i32
  }
  func.func @transform_6(%arg0: i32) -> (i32, i32) {
    %c0_i32 = arith.constant 0 : i32
    %c0_i32_0 = arith.constant 0 : i32
    %c0_i32_1 = arith.constant 0 : i32
    return %c0_i32, %c0_i32_0 : i32, i32
  }
  func.func @transform_7(%arg0: i32) -> (i32, i32) {
    %c0_i32 = arith.constant 0 : i32
    %c0_i32_0 = arith.constant 0 : i32
    %c0_i32_1 = arith.constant 0 : i32
    return %c0_i32, %c0_i32_0 : i32, i32
  }
  func.func @transform_8(%arg0: i32) -> (i32, i32) {
    %c0_i32 = arith.constant 0 : i32
    %c0_i32_0 = arith.constant 0 : i32
    %c0_i32_1 = arith.constant 0 : i32
    return %c0_i32, %c0_i32_0 : i32, i32
  }
  func.func @transform_9(%arg0: i32) -> (i32, i32) {
    %c0_i32 = arith.constant 0 : i32
    %c0_i32_0 = arith.constant 0 : i32
    %c0_i32_1 = arith.constant 0 : i32
    return %c0_i32, %c0_i32_0 : i32, i32
  }
  func.func @transform_10(%arg0: i32) -> (i32, i32) {
    %c0_i32 = arith.constant 0 : i32
    %c0_i32_0 = arith.constant 0 : i32
    return %arg0, %c0_i32 : i32, i32
  }
}

</mosaic_0001>

<bundles_post_ra>
// kernel: tpu_custom_call.1
= control target key start
LH: loop header
LB: loop body
LE: loop exit
PB: predicated region body
PF: predicated region fallthrough
CT: control target
= control target key end

     0   :  { %15 = vsyncpa [#allocation3], 0  ;;  %s740_s0 = inlined_call_operand.vmem [shape: f32[8,16], index: 0, kind: input, shape index: {}]   ;;  %s741_s1 = inlined_call_operand.hbm [shape: f32[8,32], index: 1, kind: input, shape index: {}]   ;;  %s742_s2 = inlined_call_operand.vmem [shape: f32[8,1], index: 2, kind: input, shape index: {}]   ;;  %s743_s3 = inlined_call_operand.hbm [shape: f32[16,128], index: 3, kind: input, shape index: {}]   ;;  %s744_s4 = inlined_call_operand.hbm [shape: f32[32,128], index: 4, kind: input, shape index: {}]   ;;  %s745_s5 = inlined_call_operand.vmem [shape: f32[1,128], index: 5, kind: input, shape index: {}]   ;;  %s746_s6 = inlined_call_operand.hbm [shape: f32[128,128], index: 6, kind: input, shape index: {}]   ;;  %s747_s7 = inlined_call_operand.vmem [shape: f32[1,128], index: 7, kind: input, shape index: {}]   ;;  %s748_s8 = inlined_call_operand.vmem [shape: f32[1,128], index: 8, kind: input, shape index: {}]   ;;  %s749_s9 = inlined_call_operand.vmem [shape: f32[1,128], index: 9, kind: input, shape index: {}]   ;;  %s750_s10 = inlined_call_operand.hbm [shape: f32[8,128], index: 10, kind: output, shape index: {}]  }
   0x1   :  { %16 = vsyncpa [#allocation6], 0 }
   0x2   :  { %17 = vsyncpa [#allocation9], 0 }
   0x3   :  { %18 = vsyncpa [#allocation4], 0  ;;  %s605_s13 = smov [#allocation5]  }
   0x4   :  { %s38_s14 = sshll.u32 %s605_s13, 4  ;;  %s39_s14 = int_to_ptr.vmem [resolvable:$true] %s38_s14 }
   0x5   :  { %s505_s15 = scalar_lea.vmem %s39_s14, 256  ;;  %p510_p1 = scmp.lt.s32.totalorder %s39_s14, %s39_s14 }
   0x6   :  { %p506_p0 = scmp.ne.s32.totalorder %s39_s14, %s505_s15  ;;  %p511_p2 = scmp.lt.s32.totalorder %s505_s15, %s505_s15 }
   0x8   :  { %p512_p3 = por %p511_p2, %p510_p1 }
   0xa   :  { %p513_p4 = pnand %p512_p3, %p506_p0 }
   0xc   :  { %516 = shalt.err (!%p513_p4)
}
   0xd   :  { %s606_s16 = smov 128   ;;  %s607_s17 = smov 8  }
   0xe   :  { %44 = dma.hbm_to_vmem [thread:$0]  %s743_s3, 256, %s39_s14, [#allocation6], %s606_s16, %s606_s16, %s607_s17  }
   0xf   :  { %s608_s20 = smov [#allocation2]   ;;  %s609_s22 = smov [#allocation7]  }
  0x10   :  { %s27_s21 = sshll.u32 %s608_s20, 4  ;;  %s50_s23 = sshll.u32 %s609_s22, 4  ;;  %s28_s21 = int_to_ptr.vmem [resolvable:$true] %s27_s21  ;;  %s51_s23 = int_to_ptr.vmem [resolvable:$true] %s50_s23 }
  0x11   :  { %s525_s24 = scalar_lea.vmem %s28_s21, 128  ;;  %p530_p6 = scmp.lt.s32.totalorder %s28_s21, %s28_s21 }
  0x12   :  { %p526_p5 = scmp.ne.s32.totalorder %s28_s21, %s525_s24  ;;  %p531_p7 = scmp.lt.s32.totalorder %s525_s24, %s525_s24 }
  0x14   :  { %p532_p8 = por %p531_p7, %p530_p6 }
  0x16   :  { %p533_p9 = pnand %p532_p8, %p526_p5 }
  0x18   :  { %536 = shalt.err (!%p533_p9)
}
  0x19   :  { %30 = dma.hbm_to_vmem [thread:$0]  %s741_s1, 128, %s28_s21, [#allocation3]  }
  0x1a   :  { %s545_s27 = scalar_lea.vmem %s51_s23, 512  ;;  %p550_p11 = scmp.lt.s32.totalorder %s51_s23, %s51_s23 }
  0x1b   :  { %p546_p10 = scmp.ne.s32.totalorder %s51_s23, %s545_s27  ;;  %p551_p12 = scmp.lt.s32.totalorder %s545_s27, %s545_s27 }
  0x1d   :  { %p552_p13 = por %p551_p12, %p550_p11 }
  0x1f   :  { %p553_p0 = pnand %p552_p13, %p546_p10 }
  0x21   :  { %556 = shalt.err (!%p553_p0)
}
  0x22   :  { %56 = dma.hbm_to_vmem [thread:$0]  %s744_s4, 512, %s51_s23, [#allocation6], %s606_s16, %s606_s16, %s607_s17  }
  0x23   :  { %s610_s29 = smov [#allocation8]  }
  0x24   :  { %s64_s30 = sshll.u32 %s610_s29, 4  ;;  %s65_s30 = int_to_ptr.vmem [resolvable:$true] %s64_s30 }
  0x25   :  { %s565_s11 = scalar_lea.vmem %s65_s30, 2048  ;;  %p570_p2 = scmp.lt.s32.totalorder %s65_s30, %s65_s30 }
  0x26   :  { %p566_p1 = scmp.ne.s32.totalorder %s65_s30, %s565_s11  ;;  %p571_p3 = scmp.lt.s32.totalorder %s565_s11, %s565_s11 }
  0x28   :  { %p572_p4 = por %p571_p3, %p570_p2 }
  0x2a   :  { %p573_p5 = pnand %p572_p4, %p566_p1 }
  0x2c   :  { %576 = shalt.err (!%p573_p5)
}
  0x2d   :  { %70 = dma.hbm_to_vmem [thread:$0]  %s746_s6, 2048, %s65_s30, [#allocation9], %s606_s16, %s606_s16, %s607_s17  }
  0x2e   :  { %597 = dma.done.wait [#allocation3], 128  }
  0x2f   :  { %598 = vsyncadd [#allocation3], 4294967168 }
  0x30   :  { %599 = dma.done.wait [#allocation6], 768  }
  0x31   :  { %600 = vsyncadd [#allocation6], 4294966528 }
  0x32   :  { %601 = dma.done.wait [#allocation9], 2048  }
  0x33   :  { %602 = vsyncadd [#allocation9], 4294965248  ;;  %v611_v0 = vmov 0.0   ;;  %vm612_vm0 = vmmov 0   ;;  %v96_v1 = vld [vmem:[#allocation7 + $0x18] sm:$0xff]  ;;  %v95_v2 = vld [vmem:[#allocation7 + $0x10] sm:$0xff]  ;;  %v354_v36 = vlaneseq }
  0x34   :  { %431 = vmatprep.subr.mxu0 %v611_v0  ;;  %439 = vmatprep.mubr.msk.f32.mxu0 %vm612_vm0, %v611_v0  ;;  %v94_v3 = vld [vmem:[#allocation7 + $0x8] sm:$0xff]  ;;  %v269_v4 = vld [vmem:[#allocation8 + $0x78] sm:$0xff]  ;;  %v268_v5 = vld [vmem:[#allocation8 + $0x70] sm:$0xff]  ;;  %vm97_vm1 = vcmask 261120   ;;  %vm171_vm2 = vcmask 130048   ;;  %v613_v26 = vmov 0  }
  0x35   :  { %449 = vmatprep.subr.mxu1 %v611_v0  ;;  %481 = vmatprep.mubr.msk.f32.mxu1 %vm612_vm0, %v611_v0  ;;  %v93_v6 = vld [vmem:[#allocation7] sm:$0xff]  ;;  %v267_v7 = vld [vmem:[#allocation8 + $0x68] sm:$0xff]  ;;  %v91_v9 = vld [vmem:[#allocation5 + $0x8] sm:$0xff]  ;;  %v355_v37 = vshrl.u32 %v354_v36, 7 }
  0x36   :  { %432 = vmatpush3.msra.mxu0 %v96_v1  ;;  %450 = vmatpush3.msra.mxu1 %v269_v4  ;;  %v92_v8 = vld [vmem:[#allocation2] sm:$0xff]  ;;  %v90_v10 = vld [vmem:[#allocation5] sm:$0xff]  ;;  %v266_v11 = vld [vmem:[#allocation8 + $0x60] sm:$0xff] }
  0x37   :  { %433 = vmatprep.subr.mxu0 %v611_v0  ;;  %451 = vmatprep.subr.mxu1 %v611_v0  ;;  %v89_v12 = vld [vmem:[%s740_s0] sm:$0xff]  ;;  %v265_v13 = vld [vmem:[#allocation8 + $0x58] sm:$0xff]  ;;  %v264_v14 = vld [vmem:[#allocation8 + $0x50] sm:$0xff]  ;;  %v356_v40 = vsub.s32 0, %v355_v37 }
  0x38   :  { %434 = vmatpush3.msra.mxu0 %v95_v2  ;;  %452 = vmatpush3.msra.mxu1 %v268_v5  ;;  %v263_v15 = vld [vmem:[#allocation8 + $0x48] sm:$0xff]  ;;  %v262_v16 = vld [vmem:[#allocation8 + $0x40] sm:$0xff]  ;;  %v261_v17 = vld [vmem:[#allocation8 + $0x38] sm:$0xff] }
  0x39   :  { %435 = vmatprep.subr.mxu0 %v611_v0  ;;  %453 = vmatprep.subr.mxu1 %v611_v0  ;;  %v260_v18 = vld [vmem:[#allocation8 + $0x30] sm:$0xff]  ;;  %v259_v19 = vld [vmem:[#allocation8 + $0x28] sm:$0xff]  ;;  %v258_v20 = vld [vmem:[#allocation8 + $0x20] sm:$0xff] }
  0x3a   :  { %436 = vmatpush3.msra.mxu0 %v94_v3  ;;  %454 = vmatpush3.msra.mxu1 %v267_v7  ;;  %v257_v21 = vld [vmem:[#allocation8 + $0x18] sm:$0xff]  ;;  %v256_v22 = vld [vmem:[#allocation8 + $0x10] sm:$0xff]  ;;  %v255_v23 = vld [vmem:[#allocation8 + $0x8] sm:$0xff] }
  0x3b   :  { %437 = vmatprep.subr.mxu0 %v611_v0  ;;  %455 = vmatprep.subr.mxu1 %v611_v0  ;;  %v254_v24 = vld [vmem:[#allocation8] sm:$0xff]  ;;  %v347_v25 = vld [vmem:[%s742_s2] sm:$0xff] }
  0x3c   :  { %438 = vmatpush3.msra.mxu0 %v93_v6  ;;  %456 = vmatpush3.msra.mxu1 %v266_v11  ;;  %v351_v27 = vsub.f32 0.0, %v347_v25  ;;  %v404_v31 = vld [vmem:[%s745_s5] ss:$0 sm:$0xff] }
  0x3d   :  { %440 = vmatmul.mubr.msk.f32.vlgmr.msra.gmra.mxu0 %vm97_vm1, %v92_v8  ;;  %442 = vmatprep.subr.mxu0 %v611_v0  ;;  %v349_v38 = vld [vmem:[%s748_s8] sm:$0x1] }
  0x3e   :  { %443 = vmatpush3.msra.mxu0 %v91_v9  ;;  %446 = vmatprep.mubr.msk.f32.mxu0 %vm612_vm0, %v611_v0  ;;  %v350_v39 = vand.u32 2147483647, %v349_v38  ;;  %v405_v41 = vld [vmem:[%s747_s7] ss:$0 sm:$0xff]  ;;  %s614_s7 = smov [#allocation10]  }
  0x3f   :  { %444 = vmatprep.subr.mxu0 %v611_v0  ;;  %457 = vmatprep.subr.mxu1 %v611_v0  ;;  %v348_v51 = vld [vmem:[%s749_s9] sm:$0x1]  ;;  %s391_s8 = sshll.u32 %s614_s7, 4  ;;  %s392_s8 = int_to_ptr.vmem [resolvable:$true] %s391_s8 }
  0x40   :  { %445 = vmatpush3.msra.mxu0 %v90_v10  ;;  %458 = vmatpush3.msra.mxu1 %v265_v13  ;;  %v357_v44 = vrot.slane %v350_v39, %v356_v40  ;;  %v368_v52 = vsub.f32 0.0, %v348_v51  ;;  %v381_v56 = vrot.slane %v348_v51, %v356_v40  ;;  %s577_s20 = scalar_lea.vmem %s392_s8, 128  ;;  %p582_p7 = scmp.lt.s32.totalorder %s392_s8, %s392_s8 }
  0x41   :  { %447 = vmatmul.mubr.msk.f32.vlgmr.msra.gmra.mxu0 %vm171_vm2, %v89_v12  ;;  %459 = vmatprep.subr.mxu1 %v611_v0  ;;  %p578_p6 = scmp.ne.s32.totalorder %s392_s8, %s577_s20  ;;  %p583_p8 = scmp.lt.s32.totalorder %s577_s20, %s577_s20 }
  0x42   :  { %460 = vmatpush3.msra.mxu1 %v264_v14  ;;  %494 = vset.pattern.permute.xlu0 %v613_v26  ;;  %v373_v53 = vrot.slane %v368_v52, %v356_v40 }
  0x43   :  { %461 = vmatprep.subr.mxu1 %v611_v0  ;;  %362 = vperm.xlu0 %494, %v351_v27   ;;  %p584_p9 = por %p583_p8, %p582_p7 }
  0x44   :  { %462 = vmatpush3.msra.mxu1 %v263_v15 }
  0x45   :  { %463 = vmatprep.subr.mxu1 %v611_v0  ;;  %p585_p10 = pnand %p584_p9, %p578_p6 }
  0x46   :  { %464 = vmatpush3.msra.mxu1 %v262_v16 }
  0x47   :  { %465 = vmatprep.subr.mxu1 %v611_v0 }
  0x48   :  { %466 = vmatpush3.msra.mxu1 %v261_v17 }
  0x49   :  { %467 = vmatprep.subr.mxu1 %v611_v0 }
  0x4a   :  { %468 = vmatpush3.msra.mxu1 %v260_v18 }
  0x4b   :  { %469 = vmatprep.subr.mxu1 %v611_v0 }
  0x4c   :  { %470 = vmatpush3.msra.mxu1 %v259_v19 }
  0x4d   :  { %471 = vmatprep.subr.mxu1 %v611_v0 }
  0x4e   :  { %472 = vmatpush3.msra.mxu1 %v258_v20 }
  0x4f   :  { %473 = vmatprep.subr.mxu1 %v611_v0 }
  0x50   :  { %474 = vmatpush3.msra.mxu1 %v257_v21 }
  0x51   :  { %475 = vmatprep.subr.mxu1 %v611_v0 }
  0x52   :  { %476 = vmatpush3.msra.mxu1 %v256_v22 }
  0x53   :  { %477 = vmatprep.subr.mxu1 %v611_v0 }
  0x54   :  { %478 = vmatpush3.msra.mxu1 %v255_v23 }
  0x55   :  { %479 = vmatprep.subr.mxu1 %v611_v0 }
  0x56   :  { %480 = vmatpush3.msra.mxu1 %v254_v24 }
  0xbe   :  { %v363_v47 = vpop.permute.xlu0 %362 }
  0xfd   :  { %v167_v28 = vpop.f32.mrf.mxu0 }
  0xff   :  { %v441_v29 = vpop.f32.mrf.mxu0 }
 0x101   :  { %v241_v30 = vpop.f32.mrf.mxu0 }
 0x102   :  { %v242_v32 = vadd.f32 %v241_v30, %v167_v28 }
 0x103   :  { %v448_v33 = vpop.f32.mrf.mxu0 }
 0x104   :  { %v252_v34 = vadd.f32 %v404_v31, %v242_v32 }
 0x106   :  { %v253_v35 = vmax.f32 %v252_v34, 0.0 }
 0x108   :  { %482 = vmatmul.mubr.f32.vlgmr.msra.gmra.mxu1 %v253_v35 }
 0x1c8   :  { %v343_v42 = vpop.f32.mrf.mxu1 }
 0x1c9   :  { %v344_v43 = vadd.f32 %v405_v41, %v343_v42 }
 0x1ca   :  { %v483_v45 = vpop.f32.mrf.mxu1 }
 0x1cb   :  { %v352_v46 = vand.u32 2147483647, %v344_v43 }
 0x1cd   :  { %v359_v48 = vadd.f32 %v357_v44, %v352_v46 }
 0x1cf   :  { %v365_v49 = vmul.f32 %v363_v47, %v359_v48 }
 0x1d1   :  { %v366_v50 = vmul.f32 1.442695, %v365_v49 }
 0x1d3   :  { %495 = vpow2.f32 %v366_v50 }
 0x1e0   :  { %v496_v54 = vpop.eup %495 }
 0x1e1   :  { %v375_v55 = vmul.f32 %v496_v54, %v373_v53 }
 0x1e3   :  { %v376_v57 = vmul.f32 %v375_v55, %v344_v43 }
 0x1e5   :  { %v383_v58 = vadd.f32 %v381_v56, %v376_v57 }
 0x1e7   :  { %384 = vst [vmem:[#allocation10] sm:$0xff] %v383_v58 }
 0x1e8   :  { %588 = shalt.err (!%p585_p10)
}
 0x1e9   :  { %394 = dma.vmem_to_hbm [thread:$0]  %s392_s8, 128, %s750_s10, [#allocation4]  }
 0x1ea   :  { %603 = dma.done.wait [#allocation4], 128  }
 0x1eb   :  { %604 = vsyncadd [#allocation4], 4294967168 }
 0x1ec   :  { %398 = vsyncpa [#allocation3], 1 }
 0x1ed   :  { %399 = vsyncpa [#allocation6], 1 }
 0x1ee   :  { %400 = vsyncpa [#allocation9], 1 }
 0x1ef   :  { %401 = vsyncpa [#allocation4], 1 }

</bundles_post_ra>
